<compile_context>
chip_gen: v7x
topology: tpu7x:2x2x1
jax: 0.10.0
libtpu: 0.0.40
codegen_flags: <defaults>
</compile_context>

<pallas_src>
import functools

import jax
import jax.numpy as jnp
from jax.experimental import pallas as pl
from jax.experimental.pallas import tpu as pltpu


# ---------------------------------------------------------------------------
# Kernel 1: image encoder
#   x3d:    [B, P, K]  bf16   (rows = patches per image, feature axis on lanes)
#   w_in:   [K, W]     bf16   resident
#   b_in:   [1, W]     f32    resident
#   w_proj: [W, E]     bf16   resident
#   out:    [B, E]     bf16   L2-normalized image features
# grid = (group_tiles, row_tiles); row axis is the (mean-pool) reduction.
# ---------------------------------------------------------------------------
def _image_encoder_kernel(x_ref, w_in_ref, b_in_ref, w_proj_ref, out_ref,
                          acc_ref, *, inv_rows, eps):
    r = pl.program_id(1)

    @pl.when(r == 0)
    def _():
        acc_ref[...] = jnp.zeros_like(acc_ref)

    gt, rt, k = x_ref.shape
    w = acc_ref.shape[-1]
    # per-row "transformer stand-in" matmul, then in-kernel pooling (sublane
    # reduction) instead of a dense [G, R] pooling matmul.
    h = jnp.dot(x_ref[...].reshape(gt * rt, k), w_in_ref[...],
                preferred_element_type=jnp.float32)              # [gt*rt, W] f32
    acc_ref[...] += h.reshape(gt, rt, w).sum(axis=1)             # [gt, W] f32

    @pl.when(r == pl.num_programs(1) - 1)
    def _():
        pooled = acc_ref[...] * inv_rows + b_in_ref[...]         # [gt, W] f32
        proj = jnp.dot(pooled.astype(jnp.bfloat16), w_proj_ref[...],
                       preferred_element_type=jnp.float32)       # [gt, E] f32
        inv_norm = jax.lax.rsqrt(
            jnp.sum(proj * proj, axis=-1, keepdims=True) + eps)  # fused L2 norm
        out_ref[...] = (proj * inv_norm).astype(out_ref.dtype)


def encode_image(x3d, w_in, b_in, w_proj, *, row_tile):
    g, rows, k = x3d.shape
    wdim = w_in.shape[1]
    e = w_proj.shape[1]
    assert rows % row_tile == 0
    # group tile must be a multiple of 8 (sublane) or the full group count.
    gt = 8 if (g >= 8 and g % 8 == 0) else g
    assert g % gt == 0

    kernel = functools.partial(_image_encoder_kernel,
                               inv_rows=1.0 / rows, eps=1e-12)
    return pl.pallas_call(
        kernel,
        out_shape=jax.ShapeDtypeStruct((g, e), jnp.bfloat16),
        grid_spec=pltpu.PrefetchScalarGridSpec(
            num_scalar_prefetch=0,
            grid=(g // gt, rows // row_tile),
            in_specs=[
                pl.BlockSpec((gt, row_tile, k), lambda gi, ri: (gi, ri, 0)),
                pl.BlockSpec((k, wdim), lambda gi, ri: (0, 0)),
                pl.BlockSpec((1, wdim), lambda gi, ri: (0, 0)),
                pl.BlockSpec((wdim, e), lambda gi, ri: (0, 0)),
            ],
            out_specs=pl.BlockSpec((gt, e), lambda gi, ri: (gi, 0)),
            scratch_shapes=[pltpu.VMEM((gt, wdim), jnp.float32)],
        ),
        compiler_params=pltpu.CompilerParams(
            dimension_semantics=("parallel", "arbitrary"),
            vmem_limit_bytes=32 * 1024 * 1024),
    )(x3d, w_in, b_in, w_proj)


# ---------------------------------------------------------------------------
# Kernel 2: text encoder + fused CLIP head
#   ls:     [1]          f32  (SMEM)  logit_scale
#   x3d:    [Npad, S, W] bf16         token embeddings per (padded) class
#   w_in:   [W, W]       bf16
#   b_in:   [1, W]       f32
#   w_proj: [W, E]       bf16
#   img:    [B, E]       bf16         already L2-normalized image features
#   out:    [B, Npad]    f32          logits = exp(ls) * img @ txt_norm.T
# ---------------------------------------------------------------------------
def _text_head_kernel(ls_ref, x_ref, w_in_ref, b_in_ref, w_proj_ref, img_ref,
                      out_ref, acc_ref, *, inv_rows, eps):
    r = pl.program_id(1)

    @pl.when(r == 0)
    def _():
        acc_ref[...] = jnp.zeros_like(acc_ref)

    gt, rt, k = x_ref.shape
    w = acc_ref.shape[-1]
    h = jnp.dot(x_ref[...].reshape(gt * rt, k), w_in_ref[...],
                preferred_element_type=jnp.float32)              # [gt*rt, W] f32
    acc_ref[...] += h.reshape(gt, rt, w).sum(axis=1)             # [gt, W] f32

    @pl.when(r == pl.num_programs(1) - 1)
    def _():
        pooled = acc_ref[...] * inv_rows + b_in_ref[...]         # [gt, W] f32
        proj = jnp.dot(pooled.astype(jnp.bfloat16), w_proj_ref[...],
                       preferred_element_type=jnp.float32)       # [gt, E] f32
        inv_norm = jax.lax.rsqrt(
            jnp.sum(proj * proj, axis=-1, keepdims=True) + eps)
        txt_n = (proj * inv_norm).astype(jnp.bfloat16)           # [gt, E] bf16
        # img @ txt.T without materializing a transpose (contract lane dims).
        sim = jax.lax.dot_general(
            img_ref[...], txt_n,
            dimension_numbers=(((1,), (1,)), ((), ())),
            preferred_element_type=jnp.float32)                  # [B, gt] f32
        out_ref[...] = jnp.exp(ls_ref[0]) * sim


def encode_text_and_head(logit_scale, tok3d, w_in, b_in, w_proj, img_feat, *,
                         row_tile):
    g, rows, k = tok3d.shape
    wdim = w_in.shape[1]
    e = w_proj.shape[1]
    b = img_feat.shape[0]
    assert rows % row_tile == 0
    gt = g  # full group tile: keeps the logits output block lane-dense (g % 128 == 0)

    kernel = functools.partial(_text_head_kernel,
                               inv_rows=1.0 / rows, eps=1e-12)
    return pl.pallas_call(
        kernel,
        out_shape=jax.ShapeDtypeStruct((b, g), jnp.float32),
        grid_spec=pltpu.PrefetchScalarGridSpec(
            num_scalar_prefetch=0,
            grid=(g // gt, rows // row_tile),
            in_specs=[
                pl.BlockSpec(memory_space=pltpu.MemorySpace.SMEM),        # ls
                pl.BlockSpec((gt, row_tile, k), lambda gi, ri: (gi, ri, 0)),
                pl.BlockSpec((k, wdim), lambda gi, ri: (0, 0)),
                pl.BlockSpec((1, wdim), lambda gi, ri: (0, 0)),
                pl.BlockSpec((wdim, e), lambda gi, ri: (0, 0)),
                pl.BlockSpec((b, e), lambda gi, ri: (0, 0)),
            ],
            out_specs=pl.BlockSpec((b, gt), lambda gi, ri: (0, gi)),
            scratch_shapes=[pltpu.VMEM((gt, wdim), jnp.float32)],
        ),
        compiler_params=pltpu.CompilerParams(
            dimension_semantics=("parallel", "arbitrary"),
            vmem_limit_bytes=32 * 1024 * 1024),
    )(logit_scale, tok3d, w_in, b_in, w_proj, img_feat)


# ---------------------------------------------------------------------------
# Glue: patchify, token embedding lookup, parameter setup, full forward
# ---------------------------------------------------------------------------
def patchify(image, patch):
    # NCHW -> [B, num_patches, C*patch*patch], bf16 (cast first so the
    # transpose moves half the bytes).
    # TODO(synk): fold the patch extraction into the kernel's DMA path via a
    # multi-dim BlockSpec index_map over the NCHW tensor to avoid this extra
    # HBM read+write of the image.
    b, c, h, w = image.shape
    ph, pw = h // patch, w // patch
    x = image.astype(jnp.bfloat16)
    x = x.reshape(b, c, ph, patch, pw, patch)
    x = jnp.transpose(x, (0, 2, 4, 1, 3, 5))            # [B, ph, pw, C, p, p]
    return x.reshape(b, ph * pw, c * patch * patch)


def clip_forward(params, image, tokens):
    patch = params["patch"]

    # ---- image branch (encode_image stand-in) ----
    x_img = patchify(image, patch)                                  # [B, P, Dp]
    image_features = encode_image(
        x_img, params["w_patch"], params["b_patch"], params["visual_proj"],
        row_tile=min(8, x_img.shape[1]))                            # [B, E] bf16

    # ---- text branch (encode_text stand-in) + fused CLIP head ----
    n, seq = tokens.shape
    n_pad = pl.cdiv(n, 128) * 128          # lane-dense logits; slice in glue
    tok_pad = jnp.zeros((n_pad, seq), tokens.dtype).at[:n].set(tokens)
    # token_embedding lookup (gather) stays in glue; matmuls/pool in-kernel.
    tok_emb = jnp.take(params["token_embedding"], tok_pad.reshape(-1), axis=0)
    tok3d = tok_emb.reshape(n_pad, seq, -1)                         # [Npad, S, W]

    logits_full = encode_text_and_head(
        params["logit_scale"], tok3d, params["w_text"], params["b_text"],
        params["text_proj"], image_features, row_tile=seq)          # [B, Npad]

    return logits_full[:, :n], 0


def init_params(key, *, vocab=64, width=128, embed_dim=128, patch=8,
                channels=3):
    dp = channels * patch * patch
    ks = jax.random.split(key, 5)
    # NOTE: the PyTorch module runs in fp16; bf16 operands + f32 accumulation
    # is the TPU-native equivalent.
    norm = lambda k, s: (0.02 * jax.random.normal(k, s, jnp.float32)).astype(
        jnp.bfloat16)
    return {
        "patch": patch,
        "token_embedding": norm(ks[0], (vocab, width)),
        "w_patch": norm(ks[1], (dp, width)),
        "b_patch": jnp.zeros((1, width), jnp.float32),
        "visual_proj": norm(ks[2], (width, embed_dim)),
        "w_text": norm(ks[3], (width, width)),
        "b_text": jnp.zeros((1, width), jnp.float32),
        "text_proj": norm(ks[4], (width, embed_dim)),
        # CLIP init: logit_scale = log(1 / 0.07)
        "logit_scale": jnp.array([jnp.log(1.0 / 0.07)], jnp.float32),
    }


if __name__ == "__main__":
    key = jax.random.PRNGKey(0)
    k_param, k_img, k_tok = jax.random.split(key, 3)

    params = init_params(k_param)

    # small deterministic inputs (32x32 image -> 16 patches/image -> 2 row tiles)
    B, C, H, W = 2, 3, 32, 32
    N_CLASSES, SEQ = 4, 8
    image = jax.random.normal(k_img, (B, C, H, W), jnp.float32)
    # "tokenized prompts" stand-in (clip.tokenize has no Pallas equivalent)
    tokens = jax.random.randint(k_tok, (N_CLASSES, SEQ), 0, 64, jnp.int32)

    logits, zero = clip_forward(params, image, tokens)
    logits = jax.block_until_ready(logits)

    assert logits.shape == (B, N_CLASSES), logits.shape
    assert bool(jnp.all(jnp.isfinite(logits)))
    assert zero == 0
    print("KERNEL_OK")
</pallas_src>

<mosaic_0001>
module attributes {stable_mosaic.version = 11 : i64} {
  func.func @_image_encoder_kernel(%arg0: i32, %arg1: i32, %arg2: memref<2x8x192xbf16, #tpu.memory_space<vmem>>, %arg3: memref<192x128xbf16, #tpu.memory_space<vmem>>, %arg4: memref<1x128xf32, #tpu.memory_space<vmem>>, %arg5: memref<128x128xbf16, #tpu.memory_space<vmem>>, %arg6: memref<2x128xbf16, #tpu.memory_space<vmem>>, %arg7: memref<2x128xf32, #tpu.memory_space<vmem>>) attributes {dimension_semantics = [#tpu.dimension_semantics<parallel>, #tpu.dimension_semantics<arbitrary>], iteration_bounds = array<i64: 1, 2>, scalar_prefetch = 0 : i64, scratch_operands = 1 : i64, tpu.core_type = #tpu.core_type<tc>, window_params = [{transform_indices = @transform_0, window_bounds = array<i64: 2, 8, 192>}, {pipeline_mode = #tpu.pipeline_mode<synchronous>, transform_indices = @transform_1, window_bounds = array<i64: 192, 128>}, {pipeline_mode = #tpu.pipeline_mode<synchronous>, transform_indices = @transform_2, window_bounds = array<i64: 1, 128>}, {pipeline_mode = #tpu.pipeline_mode<synchronous>, transform_indices = @transform_3, window_bounds = array<i64: 128, 128>}, {transform_indices = @transform_4, window_bounds = array<i64: 2, 128>}]} {
    %c0_i32 = arith.constant 0 : i32
    %0 = arith.cmpi eq, %arg1, %c0_i32 : i32
    %1 = arith.extui %0 : i1 to i32
    %c0_i32_0 = arith.constant 0 : i32
    %2 = arith.cmpi ne, %1, %c0_i32_0 : i32
    scf.if %2 {
      %cst_11 = arith.constant 0.000000e+00 : f32
      %15 = vector.broadcast %cst_11 : f32 to vector<2x128xf32>
      %c0_12 = arith.constant 0 : index
      %c0_13 = arith.constant 0 : index
      %16 = vector.load %arg7[%c0_12, %c0_13] : memref<2x128xf32, #tpu.memory_space<vmem>>, vector<2x128xf32>
      tpu.vector_store %arg7[%c0_12, %c0_13], %15 {strides = array<i32>} : memref<2x128xf32, #tpu.memory_space<vmem>>, vector<2x128xf32>,
    } else {
    }
    %c0 = arith.constant 0 : index
    %c0_1 = arith.constant 0 : index
    %c0_2 = arith.constant 0 : index
    %3 = vector.load %arg2[%c0, %c0_1, %c0_2] : memref<2x8x192xbf16, #tpu.memory_space<vmem>>, vector<2x8x192xbf16>
    %4 = vector.shape_cast %3 : vector<2x8x192xbf16> to vector<16x192xbf16>
    %c0_3 = arith.constant 0 : index
    %c0_4 = arith.constant 0 : index
    %5 = vector.load %arg3[%c0_3, %c0_4] : memref<192x128xbf16, #tpu.memory_space<vmem>>, vector<192x128xbf16>
    %cst = arith.constant dense<0.000000e+00> : vector<16x128xf32>
    %6 = tpu.matmul %4, %5, %cst {dimension_numbers = #tpu.dot_dimension_numbers<[1], [0], [0], [1], [0, 0, 1, 1], [], []>} : vector<16x192xbf16>, vector<192x128xbf16>, vector<16x128xf32> -> vector<16x128xf32>
    %c0_5 = arith.constant 0 : index
    %c0_6 = arith.constant 0 : index
    %7 = vector.load %arg7[%c0_5, %c0_6] : memref<2x128xf32, #tpu.memory_space<vmem>>, vector<2x128xf32>
    %8 = vector.shape_cast %6 : vector<16x128xf32> to vector<2x8x128xf32>
    %cst_7 = arith.constant dense<0.000000e+00> : vector<2x128xf32>
    %9 = vector.multi_reduction <add>, %8, %cst_7 [1] : vector<2x8x128xf32> to vector<2x128xf32>
    %10 = arith.addf %7, %9 : vector<2x128xf32>
    %c0_8 = arith.constant 0 : index
    %c0_9 = arith.constant 0 : index
    %11 = vector.load %arg7[%c0_8, %c0_9] : memref<2x128xf32, #tpu.memory_space<vmem>>, vector<2x128xf32>
    tpu.vector_store %arg7[%c0_8, %c0_9], %10 {strides = array<i32>} : memref<2x128xf32, #tpu.memory_space<vmem>>, vector<2x128xf32>,
    %c1_i32 = arith.constant 1 : i32
    %12 = arith.cmpi eq, %arg1, %c1_i32 : i32
    %13 = arith.extui %12 : i1 to i32
    %c0_i32_10 = arith.constant 0 : i32
    %14 = arith.cmpi ne, %13, %c0_i32_10 : i32
    scf.if %14 {
      %c0_11 = arith.constant 0 : index
      %c0_12 = arith.constant 0 : index
      %15 = vector.load %arg7[%c0_11, %c0_12] : memref<2x128xf32, #tpu.memory_space<vmem>>, vector<2x128xf32>
      %cst_13 = arith.constant 6.250000e-02 : f32
      %16 = vector.broadcast %cst_13 : f32 to vector<2x128xf32>
      %17 = arith.mulf %15, %16 : vector<2x128xf32>
      %c0_14 = arith.constant 0 : index
      %c0_15 = arith.constant 0 : index
      %18 = vector.load %arg4[%c0_14, %c0_15] : memref<1x128xf32, #tpu.memory_space<vmem>>, vector<1x128xf32>
      %19 = vector.broadcast %18 : vector<1x128xf32> to vector<2x128xf32>
      %20 = arith.addf %17, %19 : vector<2x128xf32>
      %21 = arith.truncf %20 : vector<2x128xf32> to vector<2x128xbf16>
      %c0_16 = arith.constant 0 : index
      %c0_17 = arith.constant 0 : index
      %22 = vector.load %arg5[%c0_16, %c0_17] : memref<128x128xbf16, #tpu.memory_space<vmem>>, vector<128x128xbf16>
      %cst_18 = arith.constant dense<0.000000e+00> : vector<2x128xf32>
      %23 = tpu.matmul %21, %22, %cst_18 {dimension_numbers = #tpu.dot_dimension_numbers<[1], [0], [0], [1], [0, 0, 1, 1], [], []>} : vector<2x128xbf16>, vector<128x128xbf16>, vector<2x128xf32> -> vector<2x128xf32>
      %24 = arith.mulf %23, %23 : vector<2x128xf32>
      %cst_19 = arith.constant dense<0.000000e+00> : vector<2xf32>
      %25 = vector.multi_reduction <add>, %24, %cst_19 [1] : vector<2x128xf32> to vector<2xf32>
      %26 = vector.shape_cast %25 : vector<2xf32> to vector<2x1xf32>
      %cst_20 = arith.constant 9.99999996E-13 : f32
      %27 = vector.broadcast %cst_20 : f32 to vector<2x1xf32>
      %28 = arith.addf %26, %27 : vector<2x1xf32>
      %29 = math.rsqrt %28 : vector<2x1xf32>
      %30 = vector.broadcast %29 : vector<2x1xf32> to vector<2x128xf32>
      %31 = arith.mulf %23, %30 : vector<2x128xf32>
      %32 = arith.truncf %31 : vector<2x128xf32> to vector<2x128xbf16>
      %c0_21 = arith.constant 0 : index
      %c0_22 = arith.constant 0 : index
      %33 = vector.load %arg6[%c0_21, %c0_22] : memref<2x128xbf16, #tpu.memory_space<vmem>>, vector<2x128xbf16>
      tpu.vector_store %arg6[%c0_21, %c0_22], %32 {strides = array<i32>} : memref<2x128xbf16, #tpu.memory_space<vmem>>, vector<2x128xbf16>,
    } else {
    }
    return
  }
  func.func @transform_0(%arg0: i32, %arg1: i32) -> (i32, i32, i32) {
    %c0_i32 = arith.constant 0 : i32
    %c0_i32_0 = arith.constant 0 : i32
    return %arg0, %arg1, %c0_i32 : i32, i32, i32
  }
  func.func @transform_1(%arg0: i32, %arg1: i32) -> (i32, i32) {
    %c0_i32 = arith.constant 0 : i32
    %c0_i32_0 = arith.constant 0 : i32
    %c0_i32_1 = arith.constant 0 : i32
    return %c0_i32, %c0_i32_0 : i32, i32
  }
  func.func @transform_2(%arg0: i32, %arg1: i32) -> (i32, i32) {
    %c0_i32 = arith.constant 0 : i32
    %c0_i32_0 = arith.constant 0 : i32
    %c0_i32_1 = arith.constant 0 : i32
    return %c0_i32, %c0_i32_0 : i32, i32
  }
  func.func @transform_3(%arg0: i32, %arg1: i32) -> (i32, i32) {
    %c0_i32 = arith.constant 0 : i32
    %c0_i32_0 = arith.constant 0 : i32
    %c0_i32_1 = arith.constant 0 : i32
    return %c0_i32, %c0_i32_0 : i32, i32
  }
  func.func @transform_4(%arg0: i32, %arg1: i32) -> (i32, i32) {
    %c0_i32 = arith.constant 0 : i32
    %c0_i32_0 = arith.constant 0 : i32
    return %arg0, %c0_i32 : i32, i32
  }
}

</mosaic_0001>

<bundles_post_ra>
// kernel: tpu_custom_call.1
= control target key start
LH: loop header
LB: loop body
LE: loop exit
PB: predicated region body
PF: predicated region fallthrough
CT: control target
= control target key end

     0   :  { %9 = vsyncpa [#allocation4], 0  ;;  %s1275_s0 = inlined_call_operand.hbm [shape: bf16[2,16,192], index: 0, kind: input, shape index: {}]   ;;  %s1276_s1 = inlined_call_operand.hbm [shape: bf16[192,128], index: 1, kind: input, shape index: {}]   ;;  %s1277_s2 = inlined_call_operand.vmem [shape: f32[1,128], index: 2, kind: input, shape index: {}]   ;;  %s1278_s3 = inlined_call_operand.hbm [shape: bf16[128,128], index: 3, kind: input, shape index: {}]   ;;  %s1279_s4 = inlined_call_operand.hbm [shape: bf16[2,128], index: 4, kind: output, shape index: {}]  }
   0x1   :  { %11 = vsyncpa [#allocation4 + $0x1], 0 }
   0x2   :  { %12 = vsyncpa [#allocation7], 0 }
   0x3   :  { %13 = vsyncpa [#allocation5], 0  ;;  %s1054_s15 = smov 0   ;;  %s1056_s16 = smov 0  }
   0x4   :  { %s1058_s17 = smov 0   ;;  %s1060_s18 = smov 0  }
   0x5   :  { %s1062_s19 = smov 0   ;;  %s1064_s20 = smov 0  }
   0x6 LB: > { %s655_s21 = sadd.s32 4294967295, %s1014_s20   ;;  %p47_p0 = scmp.ne.s32.totalorder %s1002_s17, %s998_s16  ;;  %s1014_s20 = sphi %s1064_s20, %s19_s20   ;;  %s1010_s19 = sphi %s1062_s19, %s1299_s19   ;;  %s1006_s18 = sphi %s1060_s18, %s1298_s18   ;;  %s1002_s17 = sphi %s1058_s17, %s1297_s17   ;;  %s998_s16 = sphi %s1056_s16, %s1296_s16   ;;  %s994_s15 = sphi %s1054_s15, %s1295_s15  }
   0x7   : > { %p48_p1 = scmp.eq.s32.totalorder %s1014_s20, 0  ;;  %p53_p2 = scmp.ne.s32.totalorder %s998_s16, %s994_s15 }
   0x8   : > { %p1089_p3 = scmp.eq.s32.totalorder %s655_s21, 0  ;;  %p656_p4 = scmp.ge.s32.totalorder %s1014_s20, 1 }
   0x9   : > { %p49_p5 = por %p48_p1, %p47_p0  ;;  %p153_p6 = scmp.lt.s32.totalorder %s1014_s20, 3 }
   0xa   : > { %s1285_s22 = scalar_select %p1089_p3, 1, 0 }
   0xb   : > { %p1097_p7 = por %p1089_p3, %p53_p2  ;;  %p1101_p8 = pnand %p656_p4, %p153_p6 }
   0xc   : > { %s1016_s25 = smov [#allocation6]   ;;  %p754_p11 = scmp.lt.s32.totalorder %s1014_s20, 2 }
   0xd   : > { %s1286_s23 = scalar_select %p1097_p7, 1, 0 }
   0xe   : > { %s1287_s24 = scalar_select %p1101_p8, 1, 0 }
   0xf   : > { %s165_s26 = sshll.u32 %s1016_s25, 4  ;;  %p741_p9 = pneg %p1101_p8  ;;  %s166_s26 = int_to_ptr.vmem [resolvable:$true] %s165_s26 }
  0x10   : > { %p1114_p12 = pnand %p754_p11, %p49_p5  ;;  %s844_s5 = scalar_lea.hbm %s1276_s1, 1536 }
  0x11   : > { %p1109_p10 = pnand %p741_p9, %p1089_p3  ;;  %p845_p13 = scmp.ne.s32.totalorder %s1276_s1, %s844_s5 }
  0x12   : > { %s1289_s28 = scalar_select %p1114_p12, 1, 0 }
  0x13   : > { %p846_p0 = pneg %p1109_p10  ;;  %p851_p4 = scmp.lt.u32.totalorder %s844_s5, %s1276_s1 }
  0x15   : > { %p847_p1 = pnand %p846_p0, %p845_p13 }
  0x17   : > { %p848_p2 = pneg %p847_p1 }
  0x19   : > { %p853_p5 = pnand %p851_p4, %p848_p2 }
  0x1b   : > { %856 = shalt.err (!%p853_p5)
}
  0x1c   : > { %s857_s10 = scalar_lea.vmem %s166_s26, 1536  ;;  %p865_p3 = scmp.lt.s32.totalorder %s166_s26, %s166_s26 }
  0x1d   : > { %p858_p6 = scmp.ne.s32.totalorder %s166_s26, %s857_s10  ;;  %p866_p7 = scmp.lt.s32.totalorder %s857_s10, %s857_s10 }
  0x1f   : > { %p860_p9 = pnand %p858_p6, %p846_p0  ;;  %p867_p8 = por %p866_p7, %p865_p3 }
  0x21   : > { %p861_p11 = pneg %p860_p9 }
  0x23   : > { %p868_p12 = pnand %p867_p8, %p861_p11 }
  0x25   : > { %871 = shalt.err (!%p868_p12)
}
  0x26   : > { %s1017_s11 = smov 64   ;;  %s1018_s12 = smov 4  }
  0x27   : > { %744 = dma.hbm_to_vmem [thread:$0]  (!%p1109_p10), %s1276_s1, 1536, %s166_s26, [#allocation7], %s1017_s11, %s1017_s11, %s1018_s12  }
  0x28   : > { %s1019_s15 = smov [#allocation8]   ;;  %s872_s5 = scalar_lea.hbm %s1278_s3, 1024 }
  0x29   : > { %s181_s25 = sshll.u32 %s1019_s15, 4  ;;  %p873_p3 = scmp.ne.s32.totalorder %s1278_s3, %s872_s5  ;;  %s182_s25 = int_to_ptr.vmem [resolvable:$true] %s181_s25 }
  0x2a   : > { %p879_p12 = scmp.lt.u32.totalorder %s872_s5, %s1278_s3 }
  0x2b   : > { %p875_p7 = pnand %p873_p3, %p846_p0 }
  0x2d   : > { %p876_p8 = pneg %p875_p7 }
  0x2f   : > { %p881_p13 = pnand %p879_p12, %p876_p8 }
  0x31   : > { %884 = shalt.err (!%p881_p13)
}
  0x32   : > { %s885_s26 = scalar_lea.vmem %s182_s25, 1024  ;;  %p893_p5 = scmp.lt.s32.totalorder %s182_s25, %s182_s25 }
  0x33   : > { %p886_p1 = scmp.ne.s32.totalorder %s182_s25, %s885_s26  ;;  %p894_p6 = scmp.lt.s32.totalorder %s885_s26, %s885_s26 }
  0x35   : > { %p888_p2 = pnand %p886_p1, %p846_p0  ;;  %p895_p9 = por %p894_p6, %p893_p5 }
  0x37   : > { %p889_p4 = pneg %p888_p2 }
  0x39   : > { %p896_p11 = pnand %p895_p9, %p889_p4 }
  0x3b   : > { %899 = shalt.err (!%p896_p11)
}
  0x3c   : > { %747 = dma.hbm_to_vmem [thread:$0]  (!%p1109_p10), %s1278_s3, 1024, %s182_s25, [#allocation7], %s1017_s11, %s1017_s11, %s1018_s12  }
  0x3d   : > { %s28_s14 = sadd.s32 1, %s1010_s19  ;;  %s40_s15 = sadd.s32 1, %s1002_s17 }
  0x3e   : > { %p29_p0 = scmp.ge.s32.totalorder %s28_s14, 2  ;;  %s195_s29 = sand.u32 1, %s1002_s17  }
  0x3f   : > { %s660_s30 = sshll.u32 %s195_s29, 4  ;;  %s697_s27 = sshll.u32 %s1010_s19, 7 }
  0x40   : > { %s1301_s14 = smov (%p29_p0, %s28_s14), 0  ;;  %s1171_s8 = scalar_lea.hbm %s1275_s0, %s697_s27 }
  0x41   : > { %s36_s5 = ssub.s32 %s1010_s19, %s1301_s14  ;;  %s199_s11 = scalar_lea.vmem [#allocation3], %s660_s30 }
  0x42   : > { %p38_p10 = scmp.eq.s32.totalorder %s36_s5, 0  ;;  %s209_s12 = sshll.u32 %s199_s11, 4  ;;  %s1173_s12 = int_to_ptr.vmem [resolvable:$true] %s209_s12 }
  0x43   : > { %s1178_s9 = scalar_lea.sflag [#allocation4], %s195_s29  ;;  %s900_s26 = scalar_lea.hbm %s1171_s8, 256 }
  0x44   : > { %s1176_s25 = scalar_select %p38_p10, %s1002_s17, %s40_s15  }
  0x45   : > { %p901_p3 = scmp.ne.s32.totalorder %s1171_s8, %s900_s26  ;;  %p1290_p7 = scmp.ne.s32.totalorder %s1289_s28, 0 }
  0x46   : > { %s905_s27 = scalar_lea.hbm %s1275_s0, 512  ;;  %p906_p1 = scmp.lt.u32.totalorder %s1171_s8, %s1275_s0 }
  0x47   : > { %p902_p8 = pneg %p1290_p7  ;;  %p907_p2 = scmp.lt.u32.totalorder %s905_s27, %s900_s26 }
  0x48   : > { %p909_p5 = scmp.lt.u32.totalorder %s900_s26, %s1171_s8 }
  0x49   : > { %p903_p12 = pnand %p902_p8, %p901_p3  ;;  %p908_p4 = por %p907_p2, %p906_p1 }
  0x4b   : > { %p904_p13 = pneg %p903_p12  ;;  %p910_p6 = por %p909_p5, %p908_p4 }
  0x4d   : > { %p911_p9 = pnand %p910_p6, %p904_p13 }
  0x4f   : > { %914 = shalt.err (!%p911_p9)
}
  0x50   : > { %s915_s15 = scalar_lea.vmem %s1173_s12, 256  ;;  %s1020_s29 = smov [#allocation3]  }
  0x51   : > { %p916_p11 = scmp.ne.s32.totalorder %s1173_s12, %s915_s15  ;;  %s920_s6 = sshll.u32 %s1020_s29, 4  ;;  %s921_s6 = int_to_ptr.vmem [resolvable:$false] %s920_s6 }
  0x52   : > { %s922_s7 = scalar_lea.vmem %s921_s6, 512  ;;  %p923_p3 = scmp.lt.s32.totalorder %s1173_s12, %s921_s6 }
  0x53   : > { %p918_p0 = pnand %p916_p11, %p902_p8  ;;  %p924_p12 = scmp.lt.s32.totalorder %s922_s7, %s915_s15 }
  0x55   : > { %p919_p10 = pneg %p918_p0  ;;  %p925_p1 = por %p924_p12, %p923_p3 }
  0x57   : > { %p926_p2 = pnand %p925_p1, %p919_p10 }
  0x59   : > { %929 = shalt.err (!%p926_p2)
}
  0x5a   : > { %s1021_s11 = smov 256   ;;  %s1022_s26 = smov 128  }
  0x5b   : > { %s1023_s10 = smov 8   ;;  %p1291_p8 = scmp.ne.s32.totalorder %s1287_s24, 0 }
  0x5c   : > { %751 = dma.hbm_to_vmem [thread:$0]  (!%p1290_p7), %s1171_s8, 256, %s1173_s12, %s1178_s9, %s1021_s11, %s1022_s26, %s1023_s10  }
  0x5d   : > { %221 = sbr.rel (%p1291_p8) target bundleno = 805 (0x325), region = 36  ;;  %s223_s13 = sand.u32 (!%p1291_p8), 1, %s998_s16  }
  0x5e   : > { %s1209_s27 = sshll.u32 (!%p1291_p8), %s223_s13, 4  ;;  %s224_s30 = scalar_lea.sflag (!%p1291_p8), [#allocation4], %s223_s13 }
  0x5f   : > { %s227_s5 = scalar_lea.vmem (!%p1291_p8), [#allocation3], %s1209_s27  ;;  %p1292_p13 = scmp.ne.s32.totalorder (!%p1291_p8), %s1286_s23, 0 }
  0x64   : > { %981 = dma.done.wait (%p1292_p13), %s224_s30, 256  }
  0x65   : > { %983 = vsyncadd (%p1292_p13), %s224_s30, 4294967040  ;;  %p1293_p4 = scmp.ne.s32.totalorder %s1285_s22, 0 }
  0x67   : > { %985 = dma.done.wait (%p1293_p4), [#allocation7], 2560  }
  0x68   : > { %987 = vsyncadd (%p1293_p4), [#allocation7], 4294964736  ;;  %p667_p7 = scmp.ne.s32.totalorder %s1006_s18, 0 }
  0x69   : > { %v1024_v0 = vmov (!%p667_p7), 0.0  }
  0x6a   : > { %260 = sbr.rel (%p667_p7) target bundleno = 113 (0x71), region = 52  ;;  %261 = vst [vmem:[#allocation2] sm:$0x3] (!%p667_p7), %v1024_v0 }
  0x71 PF: > { %v819_v1 = vld [vmem:[#allocation6] sm:$0xff]   ;;  %v1025_v2 = vmov 0   ;;  %v820_v3 = vld [vmem:[#allocation6 + $0x8] sm:$0xff]   ;;  %v821_v4 = vld [vmem:[#allocation6 + $0x10] sm:$0xff]   ;;  %vm369_vm0 = vcmask 523264   ;;  %vm429_vm1 = vcmask 1041409  }
  0x72   : > { %373 = vmatprep.subr.bf16.mxu0 %v1025_v2  ;;  %v822_v5 = vld [vmem:[#allocation6 + $0x18] sm:$0xff]   ;;  %v823_v7 = vld [vmem:[#allocation6 + $0x20] sm:$0xff]   ;;  %v824_v8 = vld [vmem:[#allocation6 + $0x28] sm:$0xff]   ;;  %p683_p5 = scmp.ne.s32.totalorder %s1006_s18, 1 }
  0x73   : > { %374 = vmatpush1.bf16.msra.mxu0 %v819_v1  ;;  %v833_v6 = vld [vmem:[%s227_s5 + $0x4] ss:$8 sps:$4 sm:$0xff]   ;;  %v831_v15 = vld [vmem:[%s227_s5] ss:$8 sps:$4 sm:$0xff]   ;;  %v1026_v36 = vmov (!%p683_p5), 0.0   ;;  %vm1027_vm2 = vmmov (!%p683_p5), 0  }
  0x74   : > { %375 = vmatprep.subr.bf16.mxu0 %v1025_v2  ;;  %682 = vmatprep.mubr.msk.bf16.mxu0 %vm369_vm0, %v833_v6  ;;  %v825_v9 = vld [vmem:[#allocation6 + $0x30] sm:$0xff]   ;;  %v826_v10 = vld [vmem:[#allocation6 + $0x38] sm:$0xff]   ;;  %v827_v11 = vld [vmem:[#allocation6 + $0x40] sm:$0xff]   ;;  %vm554_vm3 = vcmask (!%p683_p5), 1041408  }
  0x75   : > { %v828_v12 = vld [vmem:[#allocation6 + $0x48] sm:$0xff]   ;;  %v829_v13 = vld [vmem:[#allocation6 + $0x50] sm:$0xff]   ;;  %v830_v14 = vld [vmem:[#allocation6 + $0x58] sm:$0xff]  }
  0x76   : > { %v414_v31 = vld [vmem:[#allocation2] sm:$0x3]  ;;  %v834_v35 = vld [vmem:[#allocation8] sm:$0xff] (!%p683_p5)   ;;  %v835_v37 = vld [vmem:[#allocation8 + $0x8] sm:$0xff] (!%p683_p5)  }
  0x77   : > { %376 = vmatpush1.bf16.msra.mxu0 %v820_v3  ;;  %v836_v38 = vld [vmem:[#allocation8 + $0x10] sm:$0xff] (!%p683_p5)   ;;  %v837_v39 = vld [vmem:[#allocation8 + $0x18] sm:$0xff] (!%p683_p5)   ;;  %v838_v40 = vld [vmem:[#allocation8 + $0x20] sm:$0xff] (!%p683_p5)  }
  0x78   : > { %377 = vmatprep.subr.bf16.mxu0 %v1025_v2  ;;  %v839_v41 = vld [vmem:[#allocation8 + $0x28] sm:$0xff] (!%p683_p5)   ;;  %v840_v44 = vld [vmem:[#allocation8 + $0x30] sm:$0xff] (!%p683_p5)   ;;  %v684_v45 = vld [vmem:[%s1277_s2] ss:$0 sm:$0xff] (!%p683_p5) }
  0x79   : > { %v841_v47 = vld [vmem:[#allocation8 + $0x38] sm:$0xff] (!%p683_p5)  }
  0x7b   : > { %378 = vmatpush1.bf16.msra.mxu0 %v821_v4 }
  0x7c   : > { %379 = vmatprep.subr.bf16.mxu0 %v1025_v2 }
  0x7f   : > { %380 = vmatpush1.bf16.msra.mxu0 %v822_v5 }
  0x80   : > { %381 = vmatprep.subr.bf16.mxu0 %v1025_v2 }
  0x83   : > { %382 = vmatpush1.bf16.msra.mxu0 %v823_v7 }
  0x84   : > { %383 = vmatprep.subr.bf16.mxu0 %v1025_v2 }
  0x87   : > { %384 = vmatpush1.bf16.msra.mxu0 %v824_v8 }
  0x88   : > { %385 = vmatprep.subr.bf16.mxu0 %v1025_v2 }
  0x8b   : > { %386 = vmatpush1.bf16.msra.mxu0 %v825_v9 }
  0x8c   : > { %387 = vmatprep.subr.bf16.mxu0 %v1025_v2 }
  0x8f   : > { %388 = vmatpush1.bf16.msra.mxu0 %v826_v10 }
  0x90   : > { %389 = vmatprep.subr.bf16.mxu0 %v1025_v2 }
  0x93   : > { %390 = vmatpush1.bf16.msra.mxu0 %v827_v11 }
  0x94   : > { %391 = vmatprep.subr.bf16.mxu0 %v1025_v2 }
  0x97   : > { %392 = vmatpush1.bf16.msra.mxu0 %v828_v12 }
  0x98   : > { %393 = vmatprep.subr.bf16.mxu0 %v1025_v2 }
  0x9b   : > { %394 = vmatpush1.bf16.msra.mxu0 %v829_v13 }
  0x9c   : > { %395 = vmatprep.subr.bf16.mxu0 %v1025_v2 }
  0x9f   : > { %396 = vmatpush1.bf16.msra.mxu0 %v830_v14 }
  0xa0   : > { %707 = vmatprep.subr.bf16.mxu0 (!%p683_p5), %v1026_v36 }
  0xa2   : > { %406 = vmatmul.mubr.bf16.vlgmr.msra.gmra.mrb[0].mxu0 %v831_v15 }
  0xa3   : > { %708 = vmatpush3.bf16.msra.mxu0 (!%p683_p5), %v834_v35  ;;  %723 = vmatprep.mubr.msk.bf16.mxu0 (!%p683_p5), %vm1027_vm2, %v1026_v36 }
  0xa4   : > { %709 = vmatprep.subr.bf16.mxu0 (!%p683_p5), %v1026_v36 }
  0xa7   : > { %710 = vmatpush3.bf16.msra.mxu0 (!%p683_p5), %v835_v37 }
  0xa8   : > { %711 = vmatprep.subr.bf16.mxu0 (!%p683_p5), %v1026_v36 }
  0xab   : > { %712 = vmatpush3.bf16.msra.mxu0 (!%p683_p5), %v836_v38 }
  0xac   : > { %713 = vmatprep.subr.bf16.mxu0 (!%p683_p5), %v1026_v36 }
  0xaf   : > { %714 = vmatpush3.bf16.msra.mxu0 (!%p683_p5), %v837_v39 }
  0xb0   : > { %715 = vmatprep.subr.bf16.mxu0 (!%p683_p5), %v1026_v36 }
  0xb3   : > { %716 = vmatpush3.bf16.msra.mxu0 (!%p683_p5), %v838_v40 }
  0xb4   : > { %717 = vmatprep.subr.bf16.mxu0 (!%p683_p5), %v1026_v36 }
  0xb7   : > { %718 = vmatpush3.bf16.msra.mxu0 (!%p683_p5), %v839_v41 }
  0xb8   : > { %719 = vmatprep.subr.bf16.mxu0 (!%p683_p5), %v1026_v36 }
  0xbb   : > { %720 = vmatpush3.bf16.msra.mxu0 (!%p683_p5), %v840_v44 }
  0xbc   : > { %721 = vmatprep.subr.bf16.mxu0 (!%p683_p5), %v1026_v36 }
  0xbf   : > { %722 = vmatpush3.bf16.msra.mxu0 (!%p683_p5), %v841_v47 }
 0x175   : > { %v407_v16 = vpop.f32.mrb[0].mxu0 }
 0x176   : > { %v415_v17 = vrot.slane %v407_v16, 4  ;;  %v409_v18 = vpop.f32.mrb[1].mxu0 }
 0x177   : > { %v410_v19 = vpop.f32.mrb[2].mxu0 }
 0x178   : > { %v416_v20 = vadd.f32 %v415_v17, %v407_v16  ;;  %v421_v21 = vrot.slane %v410_v19, 4  ;;  %v412_v22 = vpop.f32.mrb[3].mxu0 }
 0x17a   : > { %v417_v23 = vrot.slane %v416_v20, 2  ;;  %v422_v24 = vadd.f32 %v421_v21, %v410_v19 }
 0x17c   : > { %v418_v25 = vadd.f32 %v417_v23, %v416_v20  ;;  %v423_v26 = vrot.slane %v422_v24, 2 }
 0x17e   : > { %v419_v27 = vrot.slane %v418_v25, 1  ;;  %v424_v28 = vadd.f32 %v423_v26, %v422_v24 }
 0x180   : > { %v425_v29 = vrot.slane %v424_v28, 1  ;;  %v420_v30 = vadd.f32 %v419_v27, %v418_v25 }
 0x181   : > { %437 = sbr.rel (%p683_p5) target bundleno = 780 (0x30c), region = 56 }
 0x182   : > { %v426_v32 = vadd.f32 %v425_v29, %v424_v28 }
 0x184   : > { %v430_v33 = vsel %vm429_vm1, %v426_v32, %v420_v30 }
 0x185   : > { %v432_v34 = vadd.f32 %v430_v33, %v414_v31 }
 0x187   : > { %433 = vst [vmem:[#allocation2] sm:$0x3] %v432_v34 }
 0x18e   : > { %v438_v42 = vld [vmem:[#allocation2] sm:$0x3] }
 0x18f   : > { %v439_v43 = vmul.f32 0.0625, %v438_v42 }
 0x191   : > { %v447_v46 = vadd.f32 %v684_v45, %v439_v43 }
 0x193   : > { %v448_v48 = vpack.c.bf16 %v447_v46, %v447_v46 }
 0x195   : > { %724 = vmatmul.mubr.bf16.vlgmr.msra.gmra.mrb[0].mxu0 %v448_v48 }
 0x268   : > { %v547_v49 = vpop.f32.mrb[0].mxu0 }
 0x269   : > { %v725_v50 = vpop.f32.mrb[1].mxu0  ;;  %v553_v51 = vmul.f32 %v547_v49, %v547_v49 }
 0x26a   : > { %v550_v52 = vpop.f32.mrb[2].mxu0 }
 0x26b   : > { %v726_v53 = vpop.f32.mrb[3].mxu0  ;;  %v555_v54 = vsel %vm554_vm3, %v553_v51, 0.0 }
 0x26c   : > { %556 = vadd.xlane.f32.xlu0 %v555_v54 }
 0x2f9   : > { %v557_v55 = vpop.xlane.xlu0 %556 }
 0x2fa   : > { %v558_v56 = vadd.f32 1e-12, %v557_v55 }
 0x2fc   : > { %842 = vrsqrt.f32 %v558_v56 }
 0x306   : > { %v843_v57 = vpop.eup %842 }
 0x307   : > { %v560_v58 = vmul.f32 %v843_v57, %v547_v49 }
 0x309   : > { %v561_v59 = vpack.c.bf16 %v560_v58, %v560_v58 }
 0x30b   : > { %562 = vst [vmem:[#allocation9] sm:$0x1] %v561_v59 }
 0x30c PF: > { %p1231_p6 = scmp.eq.s32.totalorder %s655_s21, 1  ;;  %s1028_s24 = smov [#allocation9]  }
 0x30d   : > { %s572_s28 = sshll.u32 %s1028_s24, 4  ;;  %s573_s28 = int_to_ptr.vmem [resolvable:$true] %s572_s28 }
 0x30e   : > { %s930_s8 = scalar_lea.vmem %s573_s28, 16  ;;  %s936_s12 = scalar_lea.vmem %s573_s28, 32 }
 0x30f   : > { %p931_p9 = scmp.ne.s32.totalorder %s573_s28, %s930_s8  ;;  %p937_p10 = scmp.lt.s32.totalorder %s573_s28, %s573_s28 }
 0x310   : > { %p938_p3 = scmp.lt.s32.totalorder %s936_s12, %s930_s8 }
 0x311   : > { %p932_p11 = pnand %p931_p9, %p1231_p6 }
 0x312   : > { %p939_p12 = por %p938_p3, %p937_p10 }
 0x313   : > { %p933_p0 = pneg %p932_p11 }
 0x315   : > { %p940_p1 = pnand %p939_p12, %p933_p0 }
 0x317   : > { %943 = shalt.err (!%p940_p1)
}
 0x318   : > { %s944_s15 = scalar_lea.hbm %s1279_s4, 16 }
 0x319   : > { %p945_p2 = scmp.ne.s32.totalorder %s1279_s4, %s944_s15  ;;  %p950_p4 = scmp.lt.u32.totalorder %s944_s15, %s1279_s4 }
 0x31b   : > { %p946_p8 = pnand %p945_p2, %p1231_p6 }
 0x31d   : > { %p947_p13 = pneg %p946_p8 }
 0x31f   : > { %p952_p7 = pnand %p950_p4, %p947_p13 }
 0x321   : > { %955 = shalt.err (!%p952_p7)
}
 0x322   : > { %738 = dma.vmem_to_hbm [thread:$0]  (%p1231_p6), %s573_s28, 16, %s1279_s4, [#allocation5]  }
 0x323   : > { %989 = dma.done.wait (%p1231_p6), [#allocation5], 16  }
 0x324   : > { %991 = vsyncadd (%p1231_p6), [#allocation5], 4294967280 }
 0x325 PF: > { %s19_s20 = sadd.s32 1, %s1014_s20   ;;  %s1295_s15 = smov %s998_s16 }
 0x326   : > { %p16_p5 = scmp.ge.s32.totalorder %s19_s20, 4   ;;  %s1296_s16 = smov %s1002_s17 }
 0x327   : > { %s1297_s17 = smov %s1176_s25  ;;  %s1298_s18 = smov %s1010_s19 }
 0x328   : > { %s1299_s19 = smov %s1301_s14  ;;  %18 = sbr.rel (!%p16_p5) target bundleno = 6 (0x6), region = 90 }
 0x32f   :  { %585 = vsyncpa [#allocation4], 1 }
 0x330   :  { %587 = vsyncpa [#allocation4 + $0x1], 1 }
 0x331   :  { %588 = vsyncpa [#allocation7], 1 }
 0x332   :  { %589 = vsyncpa [#allocation5], 1 }
 0x333   :  { %591 = vsyncpa [#allocation5 + $0x1], 1 }

</bundles_post_ra>
